<compile_context>
chip_gen: v7x
topology: tpu7x:2x2x1
jax: 0.10.0
libtpu: 0.0.40
codegen_flags: <defaults>
</compile_context>

<pallas_src>
import jax
import jax.numpy as jnp
from jax.experimental import pallas as pl
from jax.experimental.pallas import tpu as pltpu


def _identity_copy_kernel(x_ref, o_ref):
    # Lane-dense (TM, 768) tile -> unmasked full-lane stores.
    o_ref[...] = x_ref[...]


def view_as_heads(x69, x81, head_shape=(12, 64)):
    """Reproduces M.forward: out shape = x81 + head_shape, data = x69 viewed."""
    x82 = tuple(x81) + tuple(head_shape)          # (1, 384, 12, 64)
    batch, seq = x81
    heads, head_dim = head_shape
    hidden = x69.shape[-1]
    assert hidden == heads * head_dim
    assert x69.shape == (batch, seq, hidden)

    # glue: flatten to the contiguous 2D slab the kernel operates on (metadata only)
    rows = batch * seq
    x2d = x69.reshape(rows, hidden)

    # Single tile covering the whole slab: grid = (1,), one pipeline step.
    tm = rows  # 384
    out2d = pl.pallas_call(
        _identity_copy_kernel,
        out_shape=jax.ShapeDtypeStruct((rows, hidden), x69.dtype),
        grid_spec=pltpu.PrefetchScalarGridSpec(
            num_scalar_prefetch=0,
            grid=(rows // tm,),                                     # (1,)
            in_specs=[pl.BlockSpec((tm, hidden), lambda i: (i, 0))],
            out_specs=pl.BlockSpec((tm, hidden), lambda i: (i, 0)),
        ),
        # Donate the input buffer: identical bytes, identical shape/dtype.
        input_output_aliases={0: 0},
    )(x2d)

    # glue: free metadata reshape to the exact x82 shape (1, 384, 12, 64)
    return out2d.reshape(x82)


if __name__ == "__main__":
    key = jax.random.PRNGKey(0)
    # Shapes implied by the module: x69 = randn(1, 384, 768), x81 = (1, 384)
    x69 = jax.random.normal(key, (1, 384, 768), dtype=jnp.float32)
    x81 = (1, 384)

    x83 = view_as_heads(x69, x81, head_shape=(12, 64))
    x83 = jax.block_until_ready(x83)

    # sanity check against pure-JAX reference of torch .view semantics
    ref = x69.reshape((1, 384, 12, 64))
    assert x83.shape == (1, 384, 12, 64)
    assert x83.dtype == x69.dtype
    assert bool(jnp.array_equal(x83, ref))

    print("KERNEL_OK")
</pallas_src>

<mosaic_0001>
module attributes {stable_mosaic.version = 11 : i64} {
  func.func @_identity_copy_kernel(%arg0: i32, %arg1: memref<384x768xf32, #tpu.memory_space<vmem>>, %arg2: memref<384x768xf32, #tpu.memory_space<vmem>>) attributes {dimension_semantics = [#tpu.dimension_semantics<arbitrary>], iteration_bounds = array<i64: 1>, scalar_prefetch = 0 : i64, scratch_operands = 0 : i64, tpu.core_type = #tpu.core_type<tc>, window_params = [{transform_indices = @transform_0, window_bounds = array<i64: 384, 768>}, {transform_indices = @transform_1, window_bounds = array<i64: 384, 768>}]} {
    %c0 = arith.constant 0 : index
    %c0_0 = arith.constant 0 : index
    %0 = vector.load %arg1[%c0, %c0_0] : memref<384x768xf32, #tpu.memory_space<vmem>>, vector<384x768xf32>
    %c0_1 = arith.constant 0 : index
    %c0_2 = arith.constant 0 : index
    %1 = vector.load %arg2[%c0_1, %c0_2] : memref<384x768xf32, #tpu.memory_space<vmem>>, vector<384x768xf32>
    tpu.vector_store %arg2[%c0_1, %c0_2], %0 {strides = array<i32>} : memref<384x768xf32, #tpu.memory_space<vmem>>, vector<384x768xf32>,
    return
  }
  func.func @transform_0(%arg0: i32) -> (i32, i32) {
    %c0_i32 = arith.constant 0 : i32
    %c0_i32_0 = arith.constant 0 : i32
    return %arg0, %c0_i32 : i32, i32
  }
  func.func @transform_1(%arg0: i32) -> (i32, i32) {
    %c0_i32 = arith.constant 0 : i32
    %c0_i32_0 = arith.constant 0 : i32
    return %arg0, %c0_i32 : i32, i32
  }
}

</mosaic_0001>

<bundles_post_ra>
// kernel: tpu_custom_call.1
= control target key start
LH: loop header
LB: loop body
LE: loop exit
PB: predicated region body
PF: predicated region fallthrough
CT: control target
= control target key end

     0   :  { %6 = vsyncpa [#allocation3], 0  ;;  %s712_s0 = inlined_call_operand.hbm [shape: f32[384,768], index: 0, kind: input, shape index: {}, may-alias: {0,1}]   ;;  %s713_s1 = inlined_call_operand.hbm [shape: f32[384,768], index: 1, kind: output, shape index: {}, may-alias: {0,1}]  }
   0x1   :  { %7 = vsyncpa [#allocation4], 0  ;;  %s668_s6 = smov [#allocation2]   ;;  %s620_s10 = scalar_lea.hbm %s712_s0, 36864 }
   0x2   :  { %s13_s7 = sshll.u32 %s668_s6, 4  ;;  %p621_p0 = scmp.ne.s32.totalorder %s712_s0, %s620_s10  ;;  %s14_s7 = int_to_ptr.vmem [resolvable:$true] %s13_s7 }
   0x3   :  { %p624_p1 = scmp.lt.u32.totalorder %s620_s10, %s712_s0 }
   0x5   :  { %p626_p2 = pnand %p624_p1, %p621_p0 }
   0x7   :  { %629 = shalt.err (!%p626_p2)
}
   0x8   :  { %s630_s15 = scalar_lea.vmem %s14_s7, 36864  ;;  %p635_p4 = scmp.lt.s32.totalorder %s14_s7, %s14_s7 }
   0x9   :  { %p631_p3 = scmp.ne.s32.totalorder %s14_s7, %s630_s15  ;;  %p636_p5 = scmp.lt.s32.totalorder %s630_s15, %s630_s15 }
   0xb   :  { %p637_p6 = por %p636_p5, %p635_p4 }
   0xd   :  { %p638_p7 = pnand %p637_p6, %p631_p3 }
   0xf   :  { %641 = shalt.err (!%p638_p7)
}
  0x10   :  { %s669_s16 = smov 768   ;;  %s670_s17 = smov 48  }
  0x11   :  { %19 = dma.hbm_to_vmem [thread:$0]  %s712_s0, 36864, %s14_s7, [#allocation3], %s669_s16, %s669_s16, %s670_s17  }
  0x12   :  { %664 = dma.done.wait [#allocation3], 36864  }
  0x13   :  { %665 = vsyncadd [#allocation3], 4294930432  ;;  %v23_v0 = vld [vmem:[#allocation2] sm:$0xff]  ;;  %v24_v1 = vld [vmem:[#allocation2 + $0x8] sm:$0xff]  ;;  %s671_s0 = smov [#allocation5]  }
  0x14   :  { %v25_v2 = vld [vmem:[#allocation2 + $0x10] sm:$0xff]  ;;  %311 = vst [vmem:[#allocation5] sm:$0xff] %v23_v0  ;;  %312 = vst [vmem:[#allocation5 + $0x8] sm:$0xff] %v24_v1  ;;  %v26_v3 = vld [vmem:[#allocation2 + $0x18] sm:$0xff]  ;;  %s604_s20 = sshll.u32 %s671_s0, 4  ;;  %s605_s20 = int_to_ptr.vmem [resolvable:$true] %s604_s20 }
  0x15   :  { %313 = vst [vmem:[#allocation5 + $0x10] sm:$0xff] %v25_v2  ;;  %v27_v4 = vld [vmem:[#allocation2 + $0x20] sm:$0xff]  ;;  %v28_v5 = vld [vmem:[#allocation2 + $0x28] sm:$0xff]  ;;  %314 = vst [vmem:[#allocation5 + $0x18] sm:$0xff] %v26_v3  ;;  %s642_s21 = scalar_lea.vmem %s605_s20, 36864  ;;  %p647_p9 = scmp.lt.s32.totalorder %s605_s20, %s605_s20 }
  0x16   :  { %315 = vst [vmem:[#allocation5 + $0x20] sm:$0xff] %v27_v4  ;;  %316 = vst [vmem:[#allocation5 + $0x28] sm:$0xff] %v28_v5  ;;  %v29_v6 = vld [vmem:[#allocation2 + $0x30] sm:$0xff]  ;;  %v30_v7 = vld [vmem:[#allocation2 + $0x38] sm:$0xff]  ;;  %p643_p8 = scmp.ne.s32.totalorder %s605_s20, %s642_s21  ;;  %p648_p10 = scmp.lt.s32.totalorder %s642_s21, %s642_s21 }
  0x17   :  { %v31_v8 = vld [vmem:[#allocation2 + $0x40] sm:$0xff]  ;;  %317 = vst [vmem:[#allocation5 + $0x30] sm:$0xff] %v29_v6  ;;  %318 = vst [vmem:[#allocation5 + $0x38] sm:$0xff] %v30_v7  ;;  %v32_v9 = vld [vmem:[#allocation2 + $0x48] sm:$0xff] }
  0x18   :  { %319 = vst [vmem:[#allocation5 + $0x40] sm:$0xff] %v31_v8  ;;  %v33_v10 = vld [vmem:[#allocation2 + $0x50] sm:$0xff]  ;;  %v34_v11 = vld [vmem:[#allocation2 + $0x58] sm:$0xff]  ;;  %320 = vst [vmem:[#allocation5 + $0x48] sm:$0xff] %v32_v9  ;;  %p649_p11 = por %p648_p10, %p647_p9 }
  0x19   :  { %321 = vst [vmem:[#allocation5 + $0x50] sm:$0xff] %v33_v10  ;;  %322 = vst [vmem:[#allocation5 + $0x58] sm:$0xff] %v34_v11  ;;  %v35_v12 = vld [vmem:[#allocation2 + $0x60] sm:$0xff]  ;;  %v36_v13 = vld [vmem:[#allocation2 + $0x68] sm:$0xff] }
  0x1a   :  { %v37_v14 = vld [vmem:[#allocation2 + $0x70] sm:$0xff]  ;;  %323 = vst [vmem:[#allocation5 + $0x60] sm:$0xff] %v35_v12  ;;  %324 = vst [vmem:[#allocation5 + $0x68] sm:$0xff] %v36_v13  ;;  %v38_v15 = vld [vmem:[#allocation2 + $0x78] sm:$0xff]  ;;  %p650_p12 = pnand %p649_p11, %p643_p8 }
  0x1b   :  { %325 = vst [vmem:[#allocation5 + $0x70] sm:$0xff] %v37_v14  ;;  %v39_v16 = vld [vmem:[#allocation2 + $0x80] sm:$0xff]  ;;  %v40_v17 = vld [vmem:[#allocation2 + $0x88] sm:$0xff]  ;;  %326 = vst [vmem:[#allocation5 + $0x78] sm:$0xff] %v38_v15 }
  0x1c   :  { %327 = vst [vmem:[#allocation5 + $0x80] sm:$0xff] %v39_v16  ;;  %328 = vst [vmem:[#allocation5 + $0x88] sm:$0xff] %v40_v17  ;;  %v41_v18 = vld [vmem:[#allocation2 + $0x90] sm:$0xff]  ;;  %v42_v19 = vld [vmem:[#allocation2 + $0x98] sm:$0xff] }
  0x1d   :  { %v43_v20 = vld [vmem:[#allocation2 + $0xa0] sm:$0xff]  ;;  %329 = vst [vmem:[#allocation5 + $0x90] sm:$0xff] %v41_v18  ;;  %330 = vst [vmem:[#allocation5 + $0x98] sm:$0xff] %v42_v19  ;;  %v44_v21 = vld [vmem:[#allocation2 + $0xa8] sm:$0xff] }
  0x1e   :  { %331 = vst [vmem:[#allocation5 + $0xa0] sm:$0xff] %v43_v20  ;;  %v45_v22 = vld [vmem:[#allocation2 + $0xb0] sm:$0xff]  ;;  %v46_v23 = vld [vmem:[#allocation2 + $0xb8] sm:$0xff]  ;;  %332 = vst [vmem:[#allocation5 + $0xa8] sm:$0xff] %v44_v21 }
  0x1f   :  { %333 = vst [vmem:[#allocation5 + $0xb0] sm:$0xff] %v45_v22  ;;  %334 = vst [vmem:[#allocation5 + $0xb8] sm:$0xff] %v46_v23  ;;  %v47_v24 = vld [vmem:[#allocation2 + $0xc0] sm:$0xff]  ;;  %v48_v25 = vld [vmem:[#allocation2 + $0xc8] sm:$0xff] }
  0x20   :  { %v49_v26 = vld [vmem:[#allocation2 + $0xd0] sm:$0xff]  ;;  %335 = vst [vmem:[#allocation5 + $0xc0] sm:$0xff] %v47_v24  ;;  %336 = vst [vmem:[#allocation5 + $0xc8] sm:$0xff] %v48_v25  ;;  %v50_v27 = vld [vmem:[#allocation2 + $0xd8] sm:$0xff] }
  0x21   :  { %337 = vst [vmem:[#allocation5 + $0xd0] sm:$0xff] %v49_v26  ;;  %v51_v28 = vld [vmem:[#allocation2 + $0xe0] sm:$0xff]  ;;  %v52_v29 = vld [vmem:[#allocation2 + $0xe8] sm:$0xff]  ;;  %338 = vst [vmem:[#allocation5 + $0xd8] sm:$0xff] %v50_v27 }
  0x22   :  { %339 = vst [vmem:[#allocation5 + $0xe0] sm:$0xff] %v51_v28  ;;  %340 = vst [vmem:[#allocation5 + $0xe8] sm:$0xff] %v52_v29  ;;  %v53_v30 = vld [vmem:[#allocation2 + $0xf0] sm:$0xff]  ;;  %v54_v31 = vld [vmem:[#allocation2 + $0xf8] sm:$0xff] }
  0x23   :  { %v55_v32 = vld [vmem:[#allocation2 + $0x100] sm:$0xff]  ;;  %341 = vst [vmem:[#allocation5 + $0xf0] sm:$0xff] %v53_v30  ;;  %342 = vst [vmem:[#allocation5 + $0xf8] sm:$0xff] %v54_v31  ;;  %v56_v33 = vld [vmem:[#allocation2 + $0x108] sm:$0xff] }
  0x24   :  { %343 = vst [vmem:[#allocation5 + $0x100] sm:$0xff] %v55_v32  ;;  %v57_v34 = vld [vmem:[#allocation2 + $0x110] sm:$0xff]  ;;  %v58_v35 = vld [vmem:[#allocation2 + $0x118] sm:$0xff]  ;;  %344 = vst [vmem:[#allocation5 + $0x108] sm:$0xff] %v56_v33 }
  0x25   :  { %345 = vst [vmem:[#allocation5 + $0x110] sm:$0xff] %v57_v34  ;;  %346 = vst [vmem:[#allocation5 + $0x118] sm:$0xff] %v58_v35  ;;  %v59_v36 = vld [vmem:[#allocation2 + $0x120] sm:$0xff]  ;;  %v60_v37 = vld [vmem:[#allocation2 + $0x128] sm:$0xff] }
  0x26   :  { %v61_v38 = vld [vmem:[#allocation2 + $0x130] sm:$0xff]  ;;  %347 = vst [vmem:[#allocation5 + $0x120] sm:$0xff] %v59_v36  ;;  %348 = vst [vmem:[#allocation5 + $0x128] sm:$0xff] %v60_v37  ;;  %v62_v39 = vld [vmem:[#allocation2 + $0x138] sm:$0xff] }
  0x27   :  { %349 = vst [vmem:[#allocation5 + $0x130] sm:$0xff] %v61_v38  ;;  %v63_v40 = vld [vmem:[#allocation2 + $0x140] sm:$0xff]  ;;  %v64_v41 = vld [vmem:[#allocation2 + $0x148] sm:$0xff]  ;;  %350 = vst [vmem:[#allocation5 + $0x138] sm:$0xff] %v62_v39 }
  0x28   :  { %351 = vst [vmem:[#allocation5 + $0x140] sm:$0xff] %v63_v40  ;;  %352 = vst [vmem:[#allocation5 + $0x148] sm:$0xff] %v64_v41  ;;  %v65_v42 = vld [vmem:[#allocation2 + $0x150] sm:$0xff]  ;;  %v66_v43 = vld [vmem:[#allocation2 + $0x158] sm:$0xff] }
  0x29   :  { %v67_v44 = vld [vmem:[#allocation2 + $0x160] sm:$0xff]  ;;  %353 = vst [vmem:[#allocation5 + $0x150] sm:$0xff] %v65_v42  ;;  %354 = vst [vmem:[#allocation5 + $0x158] sm:$0xff] %v66_v43  ;;  %v68_v45 = vld [vmem:[#allocation2 + $0x168] sm:$0xff] }
  0x2a   :  { %355 = vst [vmem:[#allocation5 + $0x160] sm:$0xff] %v67_v44  ;;  %v69_v46 = vld [vmem:[#allocation2 + $0x170] sm:$0xff]  ;;  %v70_v47 = vld [vmem:[#allocation2 + $0x178] sm:$0xff]  ;;  %356 = vst [vmem:[#allocation5 + $0x168] sm:$0xff] %v68_v45 }
  0x2b   :  { %357 = vst [vmem:[#allocation5 + $0x170] sm:$0xff] %v69_v46  ;;  %358 = vst [vmem:[#allocation5 + $0x178] sm:$0xff] %v70_v47  ;;  %v71_v48 = vld [vmem:[#allocation2 + $0x180] sm:$0xff]  ;;  %v72_v49 = vld [vmem:[#allocation2 + $0x188] sm:$0xff] }
  0x2c   :  { %v73_v50 = vld [vmem:[#allocation2 + $0x190] sm:$0xff]  ;;  %359 = vst [vmem:[#allocation5 + $0x180] sm:$0xff] %v71_v48  ;;  %360 = vst [vmem:[#allocation5 + $0x188] sm:$0xff] %v72_v49  ;;  %v74_v51 = vld [vmem:[#allocation2 + $0x198] sm:$0xff] }
  0x2d   :  { %361 = vst [vmem:[#allocation5 + $0x190] sm:$0xff] %v73_v50  ;;  %v75_v52 = vld [vmem:[#allocation2 + $0x1a0] sm:$0xff]  ;;  %v76_v53 = vld [vmem:[#allocation2 + $0x1a8] sm:$0xff]  ;;  %362 = vst [vmem:[#allocation5 + $0x198] sm:$0xff] %v74_v51 }
  0x2e   :  { %363 = vst [vmem:[#allocation5 + $0x1a0] sm:$0xff] %v75_v52  ;;  %364 = vst [vmem:[#allocation5 + $0x1a8] sm:$0xff] %v76_v53  ;;  %v77_v54 = vld [vmem:[#allocation2 + $0x1b0] sm:$0xff]  ;;  %v78_v55 = vld [vmem:[#allocation2 + $0x1b8] sm:$0xff] }
  0x2f   :  { %v79_v56 = vld [vmem:[#allocation2 + $0x1c0] sm:$0xff]  ;;  %365 = vst [vmem:[#allocation5 + $0x1b0] sm:$0xff] %v77_v54  ;;  %366 = vst [vmem:[#allocation5 + $0x1b8] sm:$0xff] %v78_v55  ;;  %v80_v57 = vld [vmem:[#allocation2 + $0x1c8] sm:$0xff] }
  0x30   :  { %367 = vst [vmem:[#allocation5 + $0x1c0] sm:$0xff] %v79_v56  ;;  %v81_v58 = vld [vmem:[#allocation2 + $0x1d0] sm:$0xff]  ;;  %v82_v59 = vld [vmem:[#allocation2 + $0x1d8] sm:$0xff]  ;;  %368 = vst [vmem:[#allocation5 + $0x1c8] sm:$0xff] %v80_v57 }
  0x31   :  { %369 = vst [vmem:[#allocation5 + $0x1d0] sm:$0xff] %v81_v58  ;;  %370 = vst [vmem:[#allocation5 + $0x1d8] sm:$0xff] %v82_v59  ;;  %v83_v60 = vld [vmem:[#allocation2 + $0x1e0] sm:$0xff]  ;;  %v84_v61 = vld [vmem:[#allocation2 + $0x1e8] sm:$0xff] }
  0x32   :  { %v85_v62 = vld [vmem:[#allocation2 + $0x1f0] sm:$0xff]  ;;  %371 = vst [vmem:[#allocation5 + $0x1e0] sm:$0xff] %v83_v60  ;;  %372 = vst [vmem:[#allocation5 + $0x1e8] sm:$0xff] %v84_v61  ;;  %v86_v63 = vld [vmem:[#allocation2 + $0x1f8] sm:$0xff] }
  0x33   :  { %373 = vst [vmem:[#allocation5 + $0x1f0] sm:$0xff] %v85_v62  ;;  %v87_v0 = vld [vmem:[#allocation2 + $0x200] sm:$0xff]  ;;  %v88_v1 = vld [vmem:[#allocation2 + $0x208] sm:$0xff]  ;;  %374 = vst [vmem:[#allocation5 + $0x1f8] sm:$0xff] %v86_v63 }
  0x34   :  { %375 = vst [vmem:[#allocation5 + $0x200] sm:$0xff] %v87_v0  ;;  %376 = vst [vmem:[#allocation5 + $0x208] sm:$0xff] %v88_v1  ;;  %v89_v2 = vld [vmem:[#allocation2 + $0x210] sm:$0xff]  ;;  %v90_v3 = vld [vmem:[#allocation2 + $0x218] sm:$0xff] }
  0x35   :  { %v91_v4 = vld [vmem:[#allocation2 + $0x220] sm:$0xff]  ;;  %377 = vst [vmem:[#allocation5 + $0x210] sm:$0xff] %v89_v2  ;;  %378 = vst [vmem:[#allocation5 + $0x218] sm:$0xff] %v90_v3  ;;  %v92_v5 = vld [vmem:[#allocation2 + $0x228] sm:$0xff] }
  0x36   :  { %379 = vst [vmem:[#allocation5 + $0x220] sm:$0xff] %v91_v4  ;;  %v93_v6 = vld [vmem:[#allocation2 + $0x230] sm:$0xff]  ;;  %v94_v7 = vld [vmem:[#allocation2 + $0x238] sm:$0xff]  ;;  %380 = vst [vmem:[#allocation5 + $0x228] sm:$0xff] %v92_v5 }
  0x37   :  { %381 = vst [vmem:[#allocation5 + $0x230] sm:$0xff] %v93_v6  ;;  %382 = vst [vmem:[#allocation5 + $0x238] sm:$0xff] %v94_v7  ;;  %v95_v8 = vld [vmem:[#allocation2 + $0x240] sm:$0xff]  ;;  %v96_v9 = vld [vmem:[#allocation2 + $0x248] sm:$0xff] }
  0x38   :  { %v97_v10 = vld [vmem:[#allocation2 + $0x250] sm:$0xff]  ;;  %383 = vst [vmem:[#allocation5 + $0x240] sm:$0xff] %v95_v8  ;;  %384 = vst [vmem:[#allocation5 + $0x248] sm:$0xff] %v96_v9  ;;  %v98_v11 = vld [vmem:[#allocation2 + $0x258] sm:$0xff] }
  0x39   :  { %385 = vst [vmem:[#allocation5 + $0x250] sm:$0xff] %v97_v10  ;;  %v99_v12 = vld [vmem:[#allocation2 + $0x260] sm:$0xff]  ;;  %v100_v13 = vld [vmem:[#allocation2 + $0x268] sm:$0xff]  ;;  %386 = vst [vmem:[#allocation5 + $0x258] sm:$0xff] %v98_v11 }
  0x3a   :  { %387 = vst [vmem:[#allocation5 + $0x260] sm:$0xff] %v99_v12  ;;  %388 = vst [vmem:[#allocation5 + $0x268] sm:$0xff] %v100_v13  ;;  %v101_v14 = vld [vmem:[#allocation2 + $0x270] sm:$0xff]  ;;  %v102_v15 = vld [vmem:[#allocation2 + $0x278] sm:$0xff] }
  0x3b   :  { %v103_v16 = vld [vmem:[#allocation2 + $0x280] sm:$0xff]  ;;  %389 = vst [vmem:[#allocation5 + $0x270] sm:$0xff] %v101_v14  ;;  %390 = vst [vmem:[#allocation5 + $0x278] sm:$0xff] %v102_v15  ;;  %v104_v17 = vld [vmem:[#allocation2 + $0x288] sm:$0xff] }
  0x3c   :  { %391 = vst [vmem:[#allocation5 + $0x280] sm:$0xff] %v103_v16  ;;  %v105_v18 = vld [vmem:[#allocation2 + $0x290] sm:$0xff]  ;;  %v106_v19 = vld [vmem:[#allocation2 + $0x298] sm:$0xff]  ;;  %392 = vst [vmem:[#allocation5 + $0x288] sm:$0xff] %v104_v17 }
  0x3d   :  { %393 = vst [vmem:[#allocation5 + $0x290] sm:$0xff] %v105_v18  ;;  %394 = vst [vmem:[#allocation5 + $0x298] sm:$0xff] %v106_v19  ;;  %v107_v20 = vld [vmem:[#allocation2 + $0x2a0] sm:$0xff]  ;;  %v108_v21 = vld [vmem:[#allocation2 + $0x2a8] sm:$0xff] }
  0x3e   :  { %v109_v22 = vld [vmem:[#allocation2 + $0x2b0] sm:$0xff]  ;;  %395 = vst [vmem:[#allocation5 + $0x2a0] sm:$0xff] %v107_v20  ;;  %396 = vst [vmem:[#allocation5 + $0x2a8] sm:$0xff] %v108_v21  ;;  %v110_v23 = vld [vmem:[#allocation2 + $0x2b8] sm:$0xff] }
  0x3f   :  { %397 = vst [vmem:[#allocation5 + $0x2b0] sm:$0xff] %v109_v22  ;;  %v111_v24 = vld [vmem:[#allocation2 + $0x2c0] sm:$0xff]  ;;  %v112_v25 = vld [vmem:[#allocation2 + $0x2c8] sm:$0xff]  ;;  %398 = vst [vmem:[#allocation5 + $0x2b8] sm:$0xff] %v110_v23 }
  0x40   :  { %399 = vst [vmem:[#allocation5 + $0x2c0] sm:$0xff] %v111_v24  ;;  %400 = vst [vmem:[#allocation5 + $0x2c8] sm:$0xff] %v112_v25  ;;  %v113_v26 = vld [vmem:[#allocation2 + $0x2d0] sm:$0xff]  ;;  %v114_v27 = vld [vmem:[#allocation2 + $0x2d8] sm:$0xff] }
  0x41   :  { %v115_v28 = vld [vmem:[#allocation2 + $0x2e0] sm:$0xff]  ;;  %401 = vst [vmem:[#allocation5 + $0x2d0] sm:$0xff] %v113_v26  ;;  %402 = vst [vmem:[#allocation5 + $0x2d8] sm:$0xff] %v114_v27  ;;  %v116_v29 = vld [vmem:[#allocation2 + $0x2e8] sm:$0xff] }
  0x42   :  { %403 = vst [vmem:[#allocation5 + $0x2e0] sm:$0xff] %v115_v28  ;;  %v117_v30 = vld [vmem:[#allocation2 + $0x2f0] sm:$0xff]  ;;  %v118_v31 = vld [vmem:[#allocation2 + $0x2f8] sm:$0xff]  ;;  %404 = vst [vmem:[#allocation5 + $0x2e8] sm:$0xff] %v116_v29 }
  0x43   :  { %405 = vst [vmem:[#allocation5 + $0x2f0] sm:$0xff] %v117_v30  ;;  %406 = vst [vmem:[#allocation5 + $0x2f8] sm:$0xff] %v118_v31  ;;  %v119_v32 = vld [vmem:[#allocation2 + $0x300] sm:$0xff]  ;;  %v120_v33 = vld [vmem:[#allocation2 + $0x308] sm:$0xff] }
  0x44   :  { %v121_v34 = vld [vmem:[#allocation2 + $0x310] sm:$0xff]  ;;  %407 = vst [vmem:[#allocation5 + $0x300] sm:$0xff] %v119_v32  ;;  %408 = vst [vmem:[#allocation5 + $0x308] sm:$0xff] %v120_v33  ;;  %v122_v35 = vld [vmem:[#allocation2 + $0x318] sm:$0xff] }
  0x45   :  { %409 = vst [vmem:[#allocation5 + $0x310] sm:$0xff] %v121_v34  ;;  %v123_v36 = vld [vmem:[#allocation2 + $0x320] sm:$0xff]  ;;  %v124_v37 = vld [vmem:[#allocation2 + $0x328] sm:$0xff]  ;;  %410 = vst [vmem:[#allocation5 + $0x318] sm:$0xff] %v122_v35 }
  0x46   :  { %411 = vst [vmem:[#allocation5 + $0x320] sm:$0xff] %v123_v36  ;;  %412 = vst [vmem:[#allocation5 + $0x328] sm:$0xff] %v124_v37  ;;  %v125_v38 = vld [vmem:[#allocation2 + $0x330] sm:$0xff]  ;;  %v126_v39 = vld [vmem:[#allocation2 + $0x338] sm:$0xff] }
  0x47   :  { %v127_v40 = vld [vmem:[#allocation2 + $0x340] sm:$0xff]  ;;  %413 = vst [vmem:[#allocation5 + $0x330] sm:$0xff] %v125_v38  ;;  %414 = vst [vmem:[#allocation5 + $0x338] sm:$0xff] %v126_v39  ;;  %v128_v41 = vld [vmem:[#allocation2 + $0x348] sm:$0xff] }
  0x48   :  { %415 = vst [vmem:[#allocation5 + $0x340] sm:$0xff] %v127_v40  ;;  %v129_v42 = vld [vmem:[#allocation2 + $0x350] sm:$0xff]  ;;  %v130_v43 = vld [vmem:[#allocation2 + $0x358] sm:$0xff]  ;;  %416 = vst [vmem:[#allocation5 + $0x348] sm:$0xff] %v128_v41 }
  0x49   :  { %417 = vst [vmem:[#allocation5 + $0x350] sm:$0xff] %v129_v42  ;;  %418 = vst [vmem:[#allocation5 + $0x358] sm:$0xff] %v130_v43  ;;  %v131_v44 = vld [vmem:[#allocation2 + $0x360] sm:$0xff]  ;;  %v132_v45 = vld [vmem:[#allocation2 + $0x368] sm:$0xff] }
  0x4a   :  { %v133_v46 = vld [vmem:[#allocation2 + $0x370] sm:$0xff]  ;;  %419 = vst [vmem:[#allocation5 + $0x360] sm:$0xff] %v131_v44  ;;  %420 = vst [vmem:[#allocation5 + $0x368] sm:$0xff] %v132_v45  ;;  %v134_v47 = vld [vmem:[#allocation2 + $0x378] sm:$0xff] }
  0x4b   :  { %421 = vst [vmem:[#allocation5 + $0x370] sm:$0xff] %v133_v46  ;;  %v135_v48 = vld [vmem:[#allocation2 + $0x380] sm:$0xff]  ;;  %v136_v49 = vld [vmem:[#allocation2 + $0x388] sm:$0xff]  ;;  %422 = vst [vmem:[#allocation5 + $0x378] sm:$0xff] %v134_v47 }
  0x4c   :  { %423 = vst [vmem:[#allocation5 + $0x380] sm:$0xff] %v135_v48  ;;  %424 = vst [vmem:[#allocation5 + $0x388] sm:$0xff] %v136_v49  ;;  %v137_v50 = vld [vmem:[#allocation2 + $0x390] sm:$0xff]  ;;  %v138_v51 = vld [vmem:[#allocation2 + $0x398] sm:$0xff] }
  0x4d   :  { %v139_v52 = vld [vmem:[#allocation2 + $0x3a0] sm:$0xff]  ;;  %425 = vst [vmem:[#allocation5 + $0x390] sm:$0xff] %v137_v50  ;;  %426 = vst [vmem:[#allocation5 + $0x398] sm:$0xff] %v138_v51  ;;  %v140_v53 = vld [vmem:[#allocation2 + $0x3a8] sm:$0xff] }
  0x4e   :  { %427 = vst [vmem:[#allocation5 + $0x3a0] sm:$0xff] %v139_v52  ;;  %v141_v54 = vld [vmem:[#allocation2 + $0x3b0] sm:$0xff]  ;;  %v142_v55 = vld [vmem:[#allocation2 + $0x3b8] sm:$0xff]  ;;  %428 = vst [vmem:[#allocation5 + $0x3a8] sm:$0xff] %v140_v53 }
  0x4f   :  { %429 = vst [vmem:[#allocation5 + $0x3b0] sm:$0xff] %v141_v54  ;;  %430 = vst [vmem:[#allocation5 + $0x3b8] sm:$0xff] %v142_v55  ;;  %v143_v56 = vld [vmem:[#allocation2 + $0x3c0] sm:$0xff]  ;;  %v144_v57 = vld [vmem:[#allocation2 + $0x3c8] sm:$0xff] }
  0x50   :  { %v145_v58 = vld [vmem:[#allocation2 + $0x3d0] sm:$0xff]  ;;  %431 = vst [vmem:[#allocation5 + $0x3c0] sm:$0xff] %v143_v56  ;;  %432 = vst [vmem:[#allocation5 + $0x3c8] sm:$0xff] %v144_v57  ;;  %v146_v59 = vld [vmem:[#allocation2 + $0x3d8] sm:$0xff] }
  0x51   :  { %433 = vst [vmem:[#allocation5 + $0x3d0] sm:$0xff] %v145_v58  ;;  %v147_v60 = vld [vmem:[#allocation2 + $0x3e0] sm:$0xff]  ;;  %v148_v61 = vld [vmem:[#allocation2 + $0x3e8] sm:$0xff]  ;;  %434 = vst [vmem:[#allocation5 + $0x3d8] sm:$0xff] %v146_v59 }
  0x52   :  { %435 = vst [vmem:[#allocation5 + $0x3e0] sm:$0xff] %v147_v60  ;;  %436 = vst [vmem:[#allocation5 + $0x3e8] sm:$0xff] %v148_v61  ;;  %v149_v62 = vld [vmem:[#allocation2 + $0x3f0] sm:$0xff]  ;;  %v150_v63 = vld [vmem:[#allocation2 + $0x3f8] sm:$0xff] }
  0x53   :  { %v151_v0 = vld [vmem:[#allocation2 + $0x400] sm:$0xff]  ;;  %437 = vst [vmem:[#allocation5 + $0x3f0] sm:$0xff] %v149_v62  ;;  %438 = vst [vmem:[#allocation5 + $0x3f8] sm:$0xff] %v150_v63  ;;  %v152_v1 = vld [vmem:[#allocation2 + $0x408] sm:$0xff] }
  0x54   :  { %439 = vst [vmem:[#allocation5 + $0x400] sm:$0xff] %v151_v0  ;;  %v153_v2 = vld [vmem:[#allocation2 + $0x410] sm:$0xff]  ;;  %v154_v3 = vld [vmem:[#allocation2 + $0x418] sm:$0xff]  ;;  %440 = vst [vmem:[#allocation5 + $0x408] sm:$0xff] %v152_v1 }
  0x55   :  { %441 = vst [vmem:[#allocation5 + $0x410] sm:$0xff] %v153_v2  ;;  %442 = vst [vmem:[#allocation5 + $0x418] sm:$0xff] %v154_v3  ;;  %v155_v4 = vld [vmem:[#allocation2 + $0x420] sm:$0xff]  ;;  %v156_v5 = vld [vmem:[#allocation2 + $0x428] sm:$0xff] }
  0x56   :  { %v157_v6 = vld [vmem:[#allocation2 + $0x430] sm:$0xff]  ;;  %443 = vst [vmem:[#allocation5 + $0x420] sm:$0xff] %v155_v4  ;;  %444 = vst [vmem:[#allocation5 + $0x428] sm:$0xff] %v156_v5  ;;  %v158_v7 = vld [vmem:[#allocation2 + $0x438] sm:$0xff] }
  0x57   :  { %445 = vst [vmem:[#allocation5 + $0x430] sm:$0xff] %v157_v6  ;;  %v159_v8 = vld [vmem:[#allocation2 + $0x440] sm:$0xff]  ;;  %v160_v9 = vld [vmem:[#allocation2 + $0x448] sm:$0xff]  ;;  %446 = vst [vmem:[#allocation5 + $0x438] sm:$0xff] %v158_v7 }
  0x58   :  { %447 = vst [vmem:[#allocation5 + $0x440] sm:$0xff] %v159_v8  ;;  %448 = vst [vmem:[#allocation5 + $0x448] sm:$0xff] %v160_v9  ;;  %v161_v10 = vld [vmem:[#allocation2 + $0x450] sm:$0xff]  ;;  %v162_v11 = vld [vmem:[#allocation2 + $0x458] sm:$0xff] }
  0x59   :  { %v163_v12 = vld [vmem:[#allocation2 + $0x460] sm:$0xff]  ;;  %449 = vst [vmem:[#allocation5 + $0x450] sm:$0xff] %v161_v10  ;;  %450 = vst [vmem:[#allocation5 + $0x458] sm:$0xff] %v162_v11  ;;  %v164_v13 = vld [vmem:[#allocation2 + $0x468] sm:$0xff] }
  0x5a   :  { %451 = vst [vmem:[#allocation5 + $0x460] sm:$0xff] %v163_v12  ;;  %v165_v14 = vld [vmem:[#allocation2 + $0x470] sm:$0xff]  ;;  %v166_v15 = vld [vmem:[#allocation2 + $0x478] sm:$0xff]  ;;  %452 = vst [vmem:[#allocation5 + $0x468] sm:$0xff] %v164_v13 }
  0x5b   :  { %453 = vst [vmem:[#allocation5 + $0x470] sm:$0xff] %v165_v14  ;;  %454 = vst [vmem:[#allocation5 + $0x478] sm:$0xff] %v166_v15  ;;  %v167_v16 = vld [vmem:[#allocation2 + $0x480] sm:$0xff]  ;;  %v168_v17 = vld [vmem:[#allocation2 + $0x488] sm:$0xff] }
  0x5c   :  { %v169_v18 = vld [vmem:[#allocation2 + $0x490] sm:$0xff]  ;;  %455 = vst [vmem:[#allocation5 + $0x480] sm:$0xff] %v167_v16  ;;  %456 = vst [vmem:[#allocation5 + $0x488] sm:$0xff] %v168_v17  ;;  %v170_v19 = vld [vmem:[#allocation2 + $0x498] sm:$0xff] }
  0x5d   :  { %457 = vst [vmem:[#allocation5 + $0x490] sm:$0xff] %v169_v18  ;;  %v171_v20 = vld [vmem:[#allocation2 + $0x4a0] sm:$0xff]  ;;  %v172_v21 = vld [vmem:[#allocation2 + $0x4a8] sm:$0xff]  ;;  %458 = vst [vmem:[#allocation5 + $0x498] sm:$0xff] %v170_v19 }
  0x5e   :  { %459 = vst [vmem:[#allocation5 + $0x4a0] sm:$0xff] %v171_v20  ;;  %460 = vst [vmem:[#allocation5 + $0x4a8] sm:$0xff] %v172_v21  ;;  %v173_v22 = vld [vmem:[#allocation2 + $0x4b0] sm:$0xff]  ;;  %v174_v23 = vld [vmem:[#allocation2 + $0x4b8] sm:$0xff] }
  0x5f   :  { %v175_v24 = vld [vmem:[#allocation2 + $0x4c0] sm:$0xff]  ;;  %461 = vst [vmem:[#allocation5 + $0x4b0] sm:$0xff] %v173_v22  ;;  %462 = vst [vmem:[#allocation5 + $0x4b8] sm:$0xff] %v174_v23  ;;  %v176_v25 = vld [vmem:[#allocation2 + $0x4c8] sm:$0xff] }
  0x60   :  { %463 = vst [vmem:[#allocation5 + $0x4c0] sm:$0xff] %v175_v24  ;;  %v177_v26 = vld [vmem:[#allocation2 + $0x4d0] sm:$0xff]  ;;  %v178_v27 = vld [vmem:[#allocation2 + $0x4d8] sm:$0xff]  ;;  %464 = vst [vmem:[#allocation5 + $0x4c8] sm:$0xff] %v176_v25 }
  0x61   :  { %465 = vst [vmem:[#allocation5 + $0x4d0] sm:$0xff] %v177_v26  ;;  %466 = vst [vmem:[#allocation5 + $0x4d8] sm:$0xff] %v178_v27  ;;  %v179_v28 = vld [vmem:[#allocation2 + $0x4e0] sm:$0xff]  ;;  %v180_v29 = vld [vmem:[#allocation2 + $0x4e8] sm:$0xff] }
  0x62   :  { %v181_v30 = vld [vmem:[#allocation2 + $0x4f0] sm:$0xff]  ;;  %467 = vst [vmem:[#allocation5 + $0x4e0] sm:$0xff] %v179_v28  ;;  %468 = vst [vmem:[#allocation5 + $0x4e8] sm:$0xff] %v180_v29  ;;  %v182_v31 = vld [vmem:[#allocation2 + $0x4f8] sm:$0xff] }
  0x63   :  { %469 = vst [vmem:[#allocation5 + $0x4f0] sm:$0xff] %v181_v30  ;;  %v183_v32 = vld [vmem:[#allocation2 + $0x500] sm:$0xff]  ;;  %v184_v33 = vld [vmem:[#allocation2 + $0x508] sm:$0xff]  ;;  %470 = vst [vmem:[#allocation5 + $0x4f8] sm:$0xff] %v182_v31 }
  0x64   :  { %471 = vst [vmem:[#allocation5 + $0x500] sm:$0xff] %v183_v32  ;;  %472 = vst [vmem:[#allocation5 + $0x508] sm:$0xff] %v184_v33  ;;  %v185_v34 = vld [vmem:[#allocation2 + $0x510] sm:$0xff]  ;;  %v186_v35 = vld [vmem:[#allocation2 + $0x518] sm:$0xff] }
  0x65   :  { %v187_v36 = vld [vmem:[#allocation2 + $0x520] sm:$0xff]  ;;  %473 = vst [vmem:[#allocation5 + $0x510] sm:$0xff] %v185_v34  ;;  %474 = vst [vmem:[#allocation5 + $0x518] sm:$0xff] %v186_v35  ;;  %v188_v37 = vld [vmem:[#allocation2 + $0x528] sm:$0xff] }
  0x66   :  { %475 = vst [vmem:[#allocation5 + $0x520] sm:$0xff] %v187_v36  ;;  %v189_v38 = vld [vmem:[#allocation2 + $0x530] sm:$0xff]  ;;  %v190_v39 = vld [vmem:[#allocation2 + $0x538] sm:$0xff]  ;;  %476 = vst [vmem:[#allocation5 + $0x528] sm:$0xff] %v188_v37 }
  0x67   :  { %477 = vst [vmem:[#allocation5 + $0x530] sm:$0xff] %v189_v38  ;;  %478 = vst [vmem:[#allocation5 + $0x538] sm:$0xff] %v190_v39  ;;  %v191_v40 = vld [vmem:[#allocation2 + $0x540] sm:$0xff]  ;;  %v192_v41 = vld [vmem:[#allocation2 + $0x548] sm:$0xff] }
  0x68   :  { %v193_v42 = vld [vmem:[#allocation2 + $0x550] sm:$0xff]  ;;  %479 = vst [vmem:[#allocation5 + $0x540] sm:$0xff] %v191_v40  ;;  %480 = vst [vmem:[#allocation5 + $0x548] sm:$0xff] %v192_v41  ;;  %v194_v43 = vld [vmem:[#allocation2 + $0x558] sm:$0xff] }
  0x69   :  { %481 = vst [vmem:[#allocation5 + $0x550] sm:$0xff] %v193_v42  ;;  %v195_v44 = vld [vmem:[#allocation2 + $0x560] sm:$0xff]  ;;  %v196_v45 = vld [vmem:[#allocation2 + $0x568] sm:$0xff]  ;;  %482 = vst [vmem:[#allocation5 + $0x558] sm:$0xff] %v194_v43 }
  0x6a   :  { %483 = vst [vmem:[#allocation5 + $0x560] sm:$0xff] %v195_v44  ;;  %484 = vst [vmem:[#allocation5 + $0x568] sm:$0xff] %v196_v45  ;;  %v197_v46 = vld [vmem:[#allocation2 + $0x570] sm:$0xff]  ;;  %v198_v47 = vld [vmem:[#allocation2 + $0x578] sm:$0xff] }
  0x6b   :  { %v199_v48 = vld [vmem:[#allocation2 + $0x580] sm:$0xff]  ;;  %485 = vst [vmem:[#allocation5 + $0x570] sm:$0xff] %v197_v46  ;;  %486 = vst [vmem:[#allocation5 + $0x578] sm:$0xff] %v198_v47  ;;  %v200_v49 = vld [vmem:[#allocation2 + $0x588] sm:$0xff] }
  0x6c   :  { %487 = vst [vmem:[#allocation5 + $0x580] sm:$0xff] %v199_v48  ;;  %v201_v50 = vld [vmem:[#allocation2 + $0x590] sm:$0xff]  ;;  %v202_v51 = vld [vmem:[#allocation2 + $0x598] sm:$0xff]  ;;  %488 = vst [vmem:[#allocation5 + $0x588] sm:$0xff] %v200_v49 }
  0x6d   :  { %489 = vst [vmem:[#allocation5 + $0x590] sm:$0xff] %v201_v50  ;;  %490 = vst [vmem:[#allocation5 + $0x598] sm:$0xff] %v202_v51  ;;  %v203_v52 = vld [vmem:[#allocation2 + $0x5a0] sm:$0xff]  ;;  %v204_v53 = vld [vmem:[#allocation2 + $0x5a8] sm:$0xff] }
  0x6e   :  { %v205_v54 = vld [vmem:[#allocation2 + $0x5b0] sm:$0xff]  ;;  %491 = vst [vmem:[#allocation5 + $0x5a0] sm:$0xff] %v203_v52  ;;  %492 = vst [vmem:[#allocation5 + $0x5a8] sm:$0xff] %v204_v53  ;;  %v206_v55 = vld [vmem:[#allocation2 + $0x5b8] sm:$0xff] }
  0x6f   :  { %493 = vst [vmem:[#allocation5 + $0x5b0] sm:$0xff] %v205_v54  ;;  %v207_v56 = vld [vmem:[#allocation2 + $0x5c0] sm:$0xff]  ;;  %v208_v57 = vld [vmem:[#allocation2 + $0x5c8] sm:$0xff]  ;;  %494 = vst [vmem:[#allocation5 + $0x5b8] sm:$0xff] %v206_v55 }
  0x70   :  { %495 = vst [vmem:[#allocation5 + $0x5c0] sm:$0xff] %v207_v56  ;;  %496 = vst [vmem:[#allocation5 + $0x5c8] sm:$0xff] %v208_v57  ;;  %v209_v58 = vld [vmem:[#allocation2 + $0x5d0] sm:$0xff]  ;;  %v210_v59 = vld [vmem:[#allocation2 + $0x5d8] sm:$0xff] }
  0x71   :  { %v211_v60 = vld [vmem:[#allocation2 + $0x5e0] sm:$0xff]  ;;  %497 = vst [vmem:[#allocation5 + $0x5d0] sm:$0xff] %v209_v58  ;;  %498 = vst [vmem:[#allocation5 + $0x5d8] sm:$0xff] %v210_v59  ;;  %v212_v61 = vld [vmem:[#allocation2 + $0x5e8] sm:$0xff] }
  0x72   :  { %499 = vst [vmem:[#allocation5 + $0x5e0] sm:$0xff] %v211_v60  ;;  %v213_v62 = vld [vmem:[#allocation2 + $0x5f0] sm:$0xff]  ;;  %v214_v63 = vld [vmem:[#allocation2 + $0x5f8] sm:$0xff]  ;;  %500 = vst [vmem:[#allocation5 + $0x5e8] sm:$0xff] %v212_v61 }
  0x73   :  { %501 = vst [vmem:[#allocation5 + $0x5f0] sm:$0xff] %v213_v62  ;;  %502 = vst [vmem:[#allocation5 + $0x5f8] sm:$0xff] %v214_v63  ;;  %v215_v0 = vld [vmem:[#allocation2 + $0x600] sm:$0xff]  ;;  %v216_v1 = vld [vmem:[#allocation2 + $0x608] sm:$0xff] }
  0x74   :  { %v217_v2 = vld [vmem:[#allocation2 + $0x610] sm:$0xff]  ;;  %503 = vst [vmem:[#allocation5 + $0x600] sm:$0xff] %v215_v0  ;;  %504 = vst [vmem:[#allocation5 + $0x608] sm:$0xff] %v216_v1  ;;  %v218_v3 = vld [vmem:[#allocation2 + $0x618] sm:$0xff] }
  0x75   :  { %505 = vst [vmem:[#allocation5 + $0x610] sm:$0xff] %v217_v2  ;;  %v219_v4 = vld [vmem:[#allocation2 + $0x620] sm:$0xff]  ;;  %v220_v5 = vld [vmem:[#allocation2 + $0x628] sm:$0xff]  ;;  %506 = vst [vmem:[#allocation5 + $0x618] sm:$0xff] %v218_v3 }
  0x76   :  { %507 = vst [vmem:[#allocation5 + $0x620] sm:$0xff] %v219_v4  ;;  %508 = vst [vmem:[#allocation5 + $0x628] sm:$0xff] %v220_v5  ;;  %v221_v6 = vld [vmem:[#allocation2 + $0x630] sm:$0xff]  ;;  %v222_v7 = vld [vmem:[#allocation2 + $0x638] sm:$0xff] }
  0x77   :  { %v223_v8 = vld [vmem:[#allocation2 + $0x640] sm:$0xff]  ;;  %509 = vst [vmem:[#allocation5 + $0x630] sm:$0xff] %v221_v6  ;;  %510 = vst [vmem:[#allocation5 + $0x638] sm:$0xff] %v222_v7  ;;  %v224_v9 = vld [vmem:[#allocation2 + $0x648] sm:$0xff] }
  0x78   :  { %511 = vst [vmem:[#allocation5 + $0x640] sm:$0xff] %v223_v8  ;;  %v225_v10 = vld [vmem:[#allocation2 + $0x650] sm:$0xff]  ;;  %v226_v11 = vld [vmem:[#allocation2 + $0x658] sm:$0xff]  ;;  %512 = vst [vmem:[#allocation5 + $0x648] sm:$0xff] %v224_v9 }
  0x79   :  { %513 = vst [vmem:[#allocation5 + $0x650] sm:$0xff] %v225_v10  ;;  %514 = vst [vmem:[#allocation5 + $0x658] sm:$0xff] %v226_v11  ;;  %v227_v12 = vld [vmem:[#allocation2 + $0x660] sm:$0xff]  ;;  %v228_v13 = vld [vmem:[#allocation2 + $0x668] sm:$0xff] }
  0x7a   :  { %v229_v14 = vld [vmem:[#allocation2 + $0x670] sm:$0xff]  ;;  %515 = vst [vmem:[#allocation5 + $0x660] sm:$0xff] %v227_v12  ;;  %516 = vst [vmem:[#allocation5 + $0x668] sm:$0xff] %v228_v13  ;;  %v230_v15 = vld [vmem:[#allocation2 + $0x678] sm:$0xff] }
  0x7b   :  { %517 = vst [vmem:[#allocation5 + $0x670] sm:$0xff] %v229_v14  ;;  %v231_v16 = vld [vmem:[#allocation2 + $0x680] sm:$0xff]  ;;  %v232_v17 = vld [vmem:[#allocation2 + $0x688] sm:$0xff]  ;;  %518 = vst [vmem:[#allocation5 + $0x678] sm:$0xff] %v230_v15 }
  0x7c   :  { %519 = vst [vmem:[#allocation5 + $0x680] sm:$0xff] %v231_v16  ;;  %520 = vst [vmem:[#allocation5 + $0x688] sm:$0xff] %v232_v17  ;;  %v233_v18 = vld [vmem:[#allocation2 + $0x690] sm:$0xff]  ;;  %v234_v19 = vld [vmem:[#allocation2 + $0x698] sm:$0xff] }
  0x7d   :  { %v235_v20 = vld [vmem:[#allocation2 + $0x6a0] sm:$0xff]  ;;  %521 = vst [vmem:[#allocation5 + $0x690] sm:$0xff] %v233_v18  ;;  %522 = vst [vmem:[#allocation5 + $0x698] sm:$0xff] %v234_v19  ;;  %v236_v21 = vld [vmem:[#allocation2 + $0x6a8] sm:$0xff] }
  0x7e   :  { %523 = vst [vmem:[#allocation5 + $0x6a0] sm:$0xff] %v235_v20  ;;  %v237_v22 = vld [vmem:[#allocation2 + $0x6b0] sm:$0xff]  ;;  %v238_v23 = vld [vmem:[#allocation2 + $0x6b8] sm:$0xff]  ;;  %524 = vst [vmem:[#allocation5 + $0x6a8] sm:$0xff] %v236_v21 }
  0x7f   :  { %525 = vst [vmem:[#allocation5 + $0x6b0] sm:$0xff] %v237_v22  ;;  %526 = vst [vmem:[#allocation5 + $0x6b8] sm:$0xff] %v238_v23  ;;  %v239_v24 = vld [vmem:[#allocation2 + $0x6c0] sm:$0xff]  ;;  %v240_v25 = vld [vmem:[#allocation2 + $0x6c8] sm:$0xff] }
  0x80   :  { %v241_v26 = vld [vmem:[#allocation2 + $0x6d0] sm:$0xff]  ;;  %527 = vst [vmem:[#allocation5 + $0x6c0] sm:$0xff] %v239_v24  ;;  %528 = vst [vmem:[#allocation5 + $0x6c8] sm:$0xff] %v240_v25  ;;  %v242_v27 = vld [vmem:[#allocation2 + $0x6d8] sm:$0xff] }
  0x81   :  { %529 = vst [vmem:[#allocation5 + $0x6d0] sm:$0xff] %v241_v26  ;;  %v243_v28 = vld [vmem:[#allocation2 + $0x6e0] sm:$0xff]  ;;  %v244_v29 = vld [vmem:[#allocation2 + $0x6e8] sm:$0xff]  ;;  %530 = vst [vmem:[#allocation5 + $0x6d8] sm:$0xff] %v242_v27 }
  0x82   :  { %531 = vst [vmem:[#allocation5 + $0x6e0] sm:$0xff] %v243_v28  ;;  %532 = vst [vmem:[#allocation5 + $0x6e8] sm:$0xff] %v244_v29  ;;  %v245_v30 = vld [vmem:[#allocation2 + $0x6f0] sm:$0xff]  ;;  %v246_v31 = vld [vmem:[#allocation2 + $0x6f8] sm:$0xff] }
  0x83   :  { %v247_v32 = vld [vmem:[#allocation2 + $0x700] sm:$0xff]  ;;  %533 = vst [vmem:[#allocation5 + $0x6f0] sm:$0xff] %v245_v30  ;;  %534 = vst [vmem:[#allocation5 + $0x6f8] sm:$0xff] %v246_v31  ;;  %v248_v33 = vld [vmem:[#allocation2 + $0x708] sm:$0xff] }
  0x84   :  { %535 = vst [vmem:[#allocation5 + $0x700] sm:$0xff] %v247_v32  ;;  %v249_v34 = vld [vmem:[#allocation2 + $0x710] sm:$0xff]  ;;  %v250_v35 = vld [vmem:[#allocation2 + $0x718] sm:$0xff]  ;;  %536 = vst [vmem:[#allocation5 + $0x708] sm:$0xff] %v248_v33 }
  0x85   :  { %537 = vst [vmem:[#allocation5 + $0x710] sm:$0xff] %v249_v34  ;;  %538 = vst [vmem:[#allocation5 + $0x718] sm:$0xff] %v250_v35  ;;  %v251_v36 = vld [vmem:[#allocation2 + $0x720] sm:$0xff]  ;;  %v252_v37 = vld [vmem:[#allocation2 + $0x728] sm:$0xff] }
  0x86   :  { %v253_v38 = vld [vmem:[#allocation2 + $0x730] sm:$0xff]  ;;  %539 = vst [vmem:[#allocation5 + $0x720] sm:$0xff] %v251_v36  ;;  %540 = vst [vmem:[#allocation5 + $0x728] sm:$0xff] %v252_v37  ;;  %v254_v39 = vld [vmem:[#allocation2 + $0x738] sm:$0xff] }
  0x87   :  { %541 = vst [vmem:[#allocation5 + $0x730] sm:$0xff] %v253_v38  ;;  %v255_v40 = vld [vmem:[#allocation2 + $0x740] sm:$0xff]  ;;  %v256_v41 = vld [vmem:[#allocation2 + $0x748] sm:$0xff]  ;;  %542 = vst [vmem:[#allocation5 + $0x738] sm:$0xff] %v254_v39 }
  0x88   :  { %543 = vst [vmem:[#allocation5 + $0x740] sm:$0xff] %v255_v40  ;;  %544 = vst [vmem:[#allocation5 + $0x748] sm:$0xff] %v256_v41  ;;  %v257_v42 = vld [vmem:[#allocation2 + $0x750] sm:$0xff]  ;;  %v258_v43 = vld [vmem:[#allocation2 + $0x758] sm:$0xff] }
  0x89   :  { %v259_v44 = vld [vmem:[#allocation2 + $0x760] sm:$0xff]  ;;  %545 = vst [vmem:[#allocation5 + $0x750] sm:$0xff] %v257_v42  ;;  %546 = vst [vmem:[#allocation5 + $0x758] sm:$0xff] %v258_v43  ;;  %v260_v45 = vld [vmem:[#allocation2 + $0x768] sm:$0xff] }
  0x8a   :  { %547 = vst [vmem:[#allocation5 + $0x760] sm:$0xff] %v259_v44  ;;  %v261_v46 = vld [vmem:[#allocation2 + $0x770] sm:$0xff]  ;;  %v262_v47 = vld [vmem:[#allocation2 + $0x778] sm:$0xff]  ;;  %548 = vst [vmem:[#allocation5 + $0x768] sm:$0xff] %v260_v45 }
  0x8b   :  { %549 = vst [vmem:[#allocation5 + $0x770] sm:$0xff] %v261_v46  ;;  %550 = vst [vmem:[#allocation5 + $0x778] sm:$0xff] %v262_v47  ;;  %v263_v48 = vld [vmem:[#allocation2 + $0x780] sm:$0xff]  ;;  %v264_v49 = vld [vmem:[#allocation2 + $0x788] sm:$0xff] }
  0x8c   :  { %v265_v50 = vld [vmem:[#allocation2 + $0x790] sm:$0xff]  ;;  %551 = vst [vmem:[#allocation5 + $0x780] sm:$0xff] %v263_v48  ;;  %552 = vst [vmem:[#allocation5 + $0x788] sm:$0xff] %v264_v49  ;;  %v266_v51 = vld [vmem:[#allocation2 + $0x798] sm:$0xff] }
  0x8d   :  { %553 = vst [vmem:[#allocation5 + $0x790] sm:$0xff] %v265_v50  ;;  %v267_v52 = vld [vmem:[#allocation2 + $0x7a0] sm:$0xff]  ;;  %v268_v53 = vld [vmem:[#allocation2 + $0x7a8] sm:$0xff]  ;;  %554 = vst [vmem:[#allocation5 + $0x798] sm:$0xff] %v266_v51 }
  0x8e   :  { %555 = vst [vmem:[#allocation5 + $0x7a0] sm:$0xff] %v267_v52  ;;  %556 = vst [vmem:[#allocation5 + $0x7a8] sm:$0xff] %v268_v53  ;;  %v269_v54 = vld [vmem:[#allocation2 + $0x7b0] sm:$0xff]  ;;  %v270_v55 = vld [vmem:[#allocation2 + $0x7b8] sm:$0xff] }
  0x8f   :  { %v271_v56 = vld [vmem:[#allocation2 + $0x7c0] sm:$0xff]  ;;  %557 = vst [vmem:[#allocation5 + $0x7b0] sm:$0xff] %v269_v54  ;;  %558 = vst [vmem:[#allocation5 + $0x7b8] sm:$0xff] %v270_v55  ;;  %v272_v57 = vld [vmem:[#allocation2 + $0x7c8] sm:$0xff] }
  0x90   :  { %559 = vst [vmem:[#allocation5 + $0x7c0] sm:$0xff] %v271_v56  ;;  %v273_v58 = vld [vmem:[#allocation2 + $0x7d0] sm:$0xff]  ;;  %v274_v59 = vld [vmem:[#allocation2 + $0x7d8] sm:$0xff]  ;;  %560 = vst [vmem:[#allocation5 + $0x7c8] sm:$0xff] %v272_v57 }
  0x91   :  { %561 = vst [vmem:[#allocation5 + $0x7d0] sm:$0xff] %v273_v58  ;;  %562 = vst [vmem:[#allocation5 + $0x7d8] sm:$0xff] %v274_v59  ;;  %v275_v60 = vld [vmem:[#allocation2 + $0x7e0] sm:$0xff]  ;;  %v276_v61 = vld [vmem:[#allocation2 + $0x7e8] sm:$0xff] }
  0x92   :  { %v277_v62 = vld [vmem:[#allocation2 + $0x7f0] sm:$0xff]  ;;  %563 = vst [vmem:[#allocation5 + $0x7e0] sm:$0xff] %v275_v60  ;;  %564 = vst [vmem:[#allocation5 + $0x7e8] sm:$0xff] %v276_v61  ;;  %v278_v63 = vld [vmem:[#allocation2 + $0x7f8] sm:$0xff] }
  0x93   :  { %565 = vst [vmem:[#allocation5 + $0x7f0] sm:$0xff] %v277_v62  ;;  %v279_v0 = vld [vmem:[#allocation2 + $0x800] sm:$0xff]  ;;  %v280_v1 = vld [vmem:[#allocation2 + $0x808] sm:$0xff]  ;;  %566 = vst [vmem:[#allocation5 + $0x7f8] sm:$0xff] %v278_v63 }
  0x94   :  { %567 = vst [vmem:[#allocation5 + $0x800] sm:$0xff] %v279_v0  ;;  %568 = vst [vmem:[#allocation5 + $0x808] sm:$0xff] %v280_v1  ;;  %v281_v2 = vld [vmem:[#allocation2 + $0x810] sm:$0xff]  ;;  %v282_v3 = vld [vmem:[#allocation2 + $0x818] sm:$0xff] }
  0x95   :  { %v283_v4 = vld [vmem:[#allocation2 + $0x820] sm:$0xff]  ;;  %569 = vst [vmem:[#allocation5 + $0x810] sm:$0xff] %v281_v2  ;;  %570 = vst [vmem:[#allocation5 + $0x818] sm:$0xff] %v282_v3  ;;  %v284_v5 = vld [vmem:[#allocation2 + $0x828] sm:$0xff] }
  0x96   :  { %571 = vst [vmem:[#allocation5 + $0x820] sm:$0xff] %v283_v4  ;;  %v285_v6 = vld [vmem:[#allocation2 + $0x830] sm:$0xff]  ;;  %v286_v7 = vld [vmem:[#allocation2 + $0x838] sm:$0xff]  ;;  %572 = vst [vmem:[#allocation5 + $0x828] sm:$0xff] %v284_v5 }
  0x97   :  { %573 = vst [vmem:[#allocation5 + $0x830] sm:$0xff] %v285_v6  ;;  %574 = vst [vmem:[#allocation5 + $0x838] sm:$0xff] %v286_v7  ;;  %v287_v8 = vld [vmem:[#allocation2 + $0x840] sm:$0xff]  ;;  %v288_v9 = vld [vmem:[#allocation2 + $0x848] sm:$0xff] }
  0x98   :  { %v289_v10 = vld [vmem:[#allocation2 + $0x850] sm:$0xff]  ;;  %575 = vst [vmem:[#allocation5 + $0x840] sm:$0xff] %v287_v8  ;;  %576 = vst [vmem:[#allocation5 + $0x848] sm:$0xff] %v288_v9  ;;  %v290_v11 = vld [vmem:[#allocation2 + $0x858] sm:$0xff] }
  0x99   :  { %577 = vst [vmem:[#allocation5 + $0x850] sm:$0xff] %v289_v10  ;;  %v291_v12 = vld [vmem:[#allocation2 + $0x860] sm:$0xff]  ;;  %v292_v13 = vld [vmem:[#allocation2 + $0x868] sm:$0xff]  ;;  %578 = vst [vmem:[#allocation5 + $0x858] sm:$0xff] %v290_v11 }
  0x9a   :  { %579 = vst [vmem:[#allocation5 + $0x860] sm:$0xff] %v291_v12  ;;  %580 = vst [vmem:[#allocation5 + $0x868] sm:$0xff] %v292_v13  ;;  %v293_v14 = vld [vmem:[#allocation2 + $0x870] sm:$0xff]  ;;  %v294_v15 = vld [vmem:[#allocation2 + $0x878] sm:$0xff] }
  0x9b   :  { %v295_v16 = vld [vmem:[#allocation2 + $0x880] sm:$0xff]  ;;  %581 = vst [vmem:[#allocation5 + $0x870] sm:$0xff] %v293_v14  ;;  %582 = vst [vmem:[#allocation5 + $0x878] sm:$0xff] %v294_v15  ;;  %v296_v17 = vld [vmem:[#allocation2 + $0x888] sm:$0xff] }
  0x9c   :  { %583 = vst [vmem:[#allocation5 + $0x880] sm:$0xff] %v295_v16  ;;  %v297_v18 = vld [vmem:[#allocation2 + $0x890] sm:$0xff]  ;;  %v298_v19 = vld [vmem:[#allocation2 + $0x898] sm:$0xff]  ;;  %584 = vst [vmem:[#allocation5 + $0x888] sm:$0xff] %v296_v17 }
  0x9d   :  { %585 = vst [vmem:[#allocation5 + $0x890] sm:$0xff] %v297_v18  ;;  %586 = vst [vmem:[#allocation5 + $0x898] sm:$0xff] %v298_v19  ;;  %v299_v20 = vld [vmem:[#allocation2 + $0x8a0] sm:$0xff]  ;;  %v300_v21 = vld [vmem:[#allocation2 + $0x8a8] sm:$0xff] }
  0x9e   :  { %v301_v22 = vld [vmem:[#allocation2 + $0x8b0] sm:$0xff]  ;;  %587 = vst [vmem:[#allocation5 + $0x8a0] sm:$0xff] %v299_v20  ;;  %588 = vst [vmem:[#allocation5 + $0x8a8] sm:$0xff] %v300_v21  ;;  %v302_v23 = vld [vmem:[#allocation2 + $0x8b8] sm:$0xff] }
  0x9f   :  { %589 = vst [vmem:[#allocation5 + $0x8b0] sm:$0xff] %v301_v22  ;;  %v303_v24 = vld [vmem:[#allocation2 + $0x8c0] sm:$0xff]  ;;  %v304_v25 = vld [vmem:[#allocation2 + $0x8c8] sm:$0xff]  ;;  %590 = vst [vmem:[#allocation5 + $0x8b8] sm:$0xff] %v302_v23 }
  0xa0   :  { %591 = vst [vmem:[#allocation5 + $0x8c0] sm:$0xff] %v303_v24  ;;  %592 = vst [vmem:[#allocation5 + $0x8c8] sm:$0xff] %v304_v25  ;;  %v305_v26 = vld [vmem:[#allocation2 + $0x8d0] sm:$0xff]  ;;  %v306_v27 = vld [vmem:[#allocation2 + $0x8d8] sm:$0xff] }
  0xa1   :  { %v307_v28 = vld [vmem:[#allocation2 + $0x8e0] sm:$0xff]  ;;  %593 = vst [vmem:[#allocation5 + $0x8d0] sm:$0xff] %v305_v26  ;;  %594 = vst [vmem:[#allocation5 + $0x8d8] sm:$0xff] %v306_v27  ;;  %v308_v29 = vld [vmem:[#allocation2 + $0x8e8] sm:$0xff] }
  0xa2   :  { %595 = vst [vmem:[#allocation5 + $0x8e0] sm:$0xff] %v307_v28  ;;  %v309_v30 = vld [vmem:[#allocation2 + $0x8f0] sm:$0xff]  ;;  %v310_v31 = vld [vmem:[#allocation2 + $0x8f8] sm:$0xff]  ;;  %596 = vst [vmem:[#allocation5 + $0x8e8] sm:$0xff] %v308_v29 }
  0xa3   :  { %597 = vst [vmem:[#allocation5 + $0x8f0] sm:$0xff] %v309_v30  ;;  %598 = vst [vmem:[#allocation5 + $0x8f8] sm:$0xff] %v310_v31 }
  0xa4   :  { %653 = shalt.err (!%p650_p12)
}
  0xa5   :  { %s654_s24 = scalar_lea.hbm %s713_s1, 36864 }
  0xa6   :  { %p655_p13 = scmp.ne.s32.totalorder %s713_s1, %s654_s24  ;;  %p658_p0 = scmp.lt.u32.totalorder %s654_s24, %s713_s1 }
  0xa8   :  { %p660_p1 = pnand %p658_p0, %p655_p13 }
  0xaa   :  { %663 = shalt.err (!%p660_p1)
}
  0xab   :  { %610 = dma.vmem_to_hbm [thread:$0]  %s605_s20, 36864, %s713_s1, [#allocation4], %s669_s16, %s669_s16, %s670_s17  }
  0xac   :  { %666 = dma.done.wait [#allocation4], 36864  }
  0xad   :  { %667 = vsyncadd [#allocation4], 4294930432 }
  0xae   :  { %614 = vsyncpa [#allocation3], 1 }
  0xaf   :  { %615 = vsyncpa [#allocation4], 1 }

</bundles_post_ra>
